<compile_context>
chip_gen: v7x
topology: tpu7x:2x2x1
jax: 0.10.0
libtpu: 0.0.40
codegen_flags: <defaults>
</compile_context>

<pallas_src>
from functools import partial

import jax
import jax.numpy as jnp
from jax.experimental import pallas as pl
from jax.experimental.pallas import tpu as pltpu

STATE_DIM = 6
SCAN_DIM = 720
IN_DIM = STATE_DIM + SCAN_DIM          # 726
HIDDEN = 128                           # ScanEncoder hidden / repr_dim
REPR_DIM = 128                         # StateEncoder repr_dim (module output)

MAX_BATCH_TILE = 1024                  # safe across v5e/v6e/v7x default scoped VMEM


def _round_up(n, m):
    return (n + m - 1) // m * m


def _pick_tile(B):
    """Rows per grid step: big (amortize per-step overhead), multiple of 8,
    >= 2 grid steps when the batch allows (feeds both v7x TensorCores)."""
    if B <= 8:
        return 8
    return min(MAX_BATCH_TILE, _round_up(pl.cdiv(B, 2), 8))


def robot_base_kernel(x_ref, w1_ref, b1_ref, w2_ref, b2_ref,
                      w3s_ref, w3f_ref, b3_ref, out_ref):
    """Fused ScanEncoder + concat + StateEncoder for one batch tile.

    x_ref   : (bm, 726) rows [robot_state(6) | robot_scan(720)], f32 or bf16
    w1_ref  : (726, 128) bf16 -- ScanEncoder L1, zero-padded with 6 leading rows
              so x @ w1 == scan @ W1 (no column slicing of x).
    w2_ref  : (128, 128) bf16 -- ScanEncoder L2
    w3s_ref : (128, 128) bf16 -- StateEncoder state rows W3[:6] zero-padded to 128 rows,
              applied to the lane-aligned xb[:, :128] slice (cols 6.. see zero rows).
    w3f_ref : (128, 128) bf16 -- StateEncoder rows multiplying the scan features
    Strictly row-wise: safe with a partial (masked) last batch block.
    """
    xb = x_ref[...].astype(jnp.bfloat16)      # no-op when x is already bf16

    # Hoisted bias loads (read once per tile).
    b1 = b1_ref[...]
    b2 = b2_ref[...]
    b3 = b3_ref[...]

    # ScanEncoder: Linear+ReLU, Linear+ReLU (bf16 operands, f32 MXU accumulate).
    h1 = jnp.dot(xb, w1_ref[...], preferred_element_type=jnp.float32) + b1
    h1 = jnp.maximum(h1, 0.0)
    h2 = jnp.dot(h1.astype(jnp.bfloat16), w2_ref[...],
                 preferred_element_type=jnp.float32) + b2
    h2 = jnp.maximum(h2, 0.0)

    # StateEncoder on cat([state, h2], -1) via row-split of W3:
    #   cat([state, h2]) @ W3 == state @ W3[:6] + h2 @ W3[6:]
    # State term as a tiny extra MXU pass (K=128, lane-aligned slice, zero-padded
    # weight rows 6..127) instead of 6 cross-lane column extracts on the VPU.
    pre = (jnp.dot(h2.astype(jnp.bfloat16), w3f_ref[...],
                   preferred_element_type=jnp.float32)
           + jnp.dot(xb[:, :HIDDEN], w3s_ref[...],
                     preferred_element_type=jnp.float32)
           + b3)
    out_ref[...] = jnp.maximum(pre, 0.0).astype(out_ref.dtype)


@partial(jax.jit, static_argnames=("out_dtype",))
def robot_base_forward(x, params, out_dtype=jnp.float32):
    """x: (B, 726) float32 or bfloat16. Returns (B, 128) `out_dtype`."""
    B = x.shape[0]
    w1p, b1, w2, b2, w3s, w3f, b3 = params

    bm = _pick_tile(B)
    grid = (pl.cdiv(B, bm),)                 # partial last block OK (row-wise kernel)

    row_spec = lambda shape: pl.BlockSpec(shape, lambda i: (i, 0))
    const_spec = lambda shape: pl.BlockSpec(shape, lambda i: (0, 0))

    return pl.pallas_call(
        robot_base_kernel,
        out_shape=jax.ShapeDtypeStruct((B, REPR_DIM), out_dtype),
        grid_spec=pltpu.PrefetchScalarGridSpec(
            num_scalar_prefetch=0,
            grid=grid,
            in_specs=[
                row_spec((bm, IN_DIM)),             # x (whole rows, no slicing/padding)
                const_spec((IN_DIM, HIDDEN)),       # w1 (zero-padded), bf16
                const_spec((1, HIDDEN)),            # b1
                const_spec((HIDDEN, HIDDEN)),       # w2, bf16
                const_spec((1, HIDDEN)),            # b2
                const_spec((HIDDEN, REPR_DIM)),     # w3 state rows, zero-padded, bf16
                const_spec((HIDDEN, REPR_DIM)),     # w3 feature rows, bf16
                const_spec((1, REPR_DIM)),          # b3
            ],
            out_specs=row_spec((bm, REPR_DIM)),
        ),
        compiler_params=pltpu.CompilerParams(
            dimension_semantics=("parallel",)),
    )(x, w1p, b1, w2, b2, w3s, w3f, b3)


def init_params(key):
    """PyTorch-Linear-style uniform init, f32 'master' weights."""
    ks = jax.random.split(key, 3)

    def linear(k, fan_in, fan_out):
        bound = 1.0 / jnp.sqrt(jnp.float32(fan_in))
        kw, kb = jax.random.split(k)
        w = jax.random.uniform(kw, (fan_in, fan_out), jnp.float32, -bound, bound)
        b = jax.random.uniform(kb, (1, fan_out), jnp.float32, -bound, bound)
        return w, b

    w1, b1 = linear(ks[0], SCAN_DIM, HIDDEN)
    w2, b2 = linear(ks[1], HIDDEN, HIDDEN)
    w3, b3 = linear(ks[2], STATE_DIM + HIDDEN, REPR_DIM)
    return (w1, b1, w2, b2, w3, b3)


def pack_params(params):
    """Kernel layout: zero-padded W1, row-split W3 (state rows zero-padded to 128),
    bf16 MXU weights, f32 biases."""
    w1, b1, w2, b2, w3, b3 = params
    w1p = jnp.concatenate(
        [jnp.zeros((STATE_DIM, HIDDEN), w1.dtype), w1], axis=0)          # (726, 128)
    w3s_pad = jnp.zeros((HIDDEN, REPR_DIM), w3.dtype).at[:STATE_DIM].set(
        w3[:STATE_DIM, :])                                               # (128, 128)
    return (w1p.astype(jnp.bfloat16), b1,
            w2.astype(jnp.bfloat16), b2,
            w3s_pad.astype(jnp.bfloat16),
            w3[STATE_DIM:, :].astype(jnp.bfloat16), b3)


def reference_forward_f32(x, params):
    """Pure-f32 reference identical to the assumed PyTorch module."""
    w1, b1, w2, b2, w3, b3 = params
    state = x[:, :STATE_DIM]
    scan = x[:, STATE_DIM:IN_DIM]
    h1 = jnp.maximum(scan @ w1 + b1, 0.0)
    h2 = jnp.maximum(h1 @ w2 + b2, 0.0)
    cat = jnp.concatenate([state, h2], axis=-1)
    return jnp.maximum(cat @ w3 + b3, 0.0)


def reference_forward_mixed(x, params):
    """Mirror of the kernel numerics (bf16 MXU operands, f32 accumulation)."""
    w1, b1, w2, b2, w3, b3 = params
    c = lambda a: a.astype(jnp.bfloat16)
    f32 = jnp.float32
    xb = c(x)
    h1 = jnp.maximum(
        jnp.dot(xb[:, STATE_DIM:IN_DIM], c(w1), preferred_element_type=f32) + b1, 0.0)
    h2 = jnp.maximum(jnp.dot(c(h1), c(w2), preferred_element_type=f32) + b2, 0.0)
    pre = (jnp.dot(c(h2), c(w3[STATE_DIM:]), preferred_element_type=f32)
           + jnp.dot(xb[:, :STATE_DIM], c(w3[:STATE_DIM]), preferred_element_type=f32)
           + b3)
    return jnp.maximum(pre, 0.0)


if __name__ == "__main__":
    key = jax.random.PRNGKey(0)
    k_x, k_p = jax.random.split(key)

    # Small demo batch; 13 is deliberately not a multiple of the tile so the
    # partial-last-block (no-pad) path is exercised. Real workloads use >= 512 rows.
    B = 13
    x = jax.random.normal(k_x, (B, IN_DIM), jnp.float32)
    master = init_params(k_p)
    params = pack_params(master)

    out = jax.block_until_ready(robot_base_forward(x, params))
    assert out.shape == (B, REPR_DIM)
    assert out.dtype == jnp.float32

    ref_mixed = reference_forward_mixed(x, master)
    ref_f32 = reference_forward_f32(x, master)
    assert jnp.allclose(out, ref_mixed, atol=2e-2, rtol=2e-2), \
        "mismatch vs mixed-precision reference"
    assert jnp.allclose(out, ref_f32, atol=1e-1, rtol=1e-1), \
        "mismatch vs f32 reference"

    # bf16-input fast path (preferred caller contract: halves input HBM bytes).
    out_bf16_in = jax.block_until_ready(robot_base_forward(x.astype(jnp.bfloat16), params))
    assert jnp.allclose(out_bf16_in, ref_mixed, atol=2e-2, rtol=2e-2), \
        "mismatch vs mixed-precision reference (bf16 input)"

    print("KERNEL_OK")
</pallas_src>

<mosaic_0001>
module attributes {stable_mosaic.version = 11 : i64} {
  func.func @robot_base_kernel(%arg0: i32, %arg1: memref<8x726xf32, #tpu.memory_space<vmem>>, %arg2: memref<726x128xbf16, #tpu.memory_space<vmem>>, %arg3: memref<1x128xf32, #tpu.memory_space<vmem>>, %arg4: memref<128x128xbf16, #tpu.memory_space<vmem>>, %arg5: memref<1x128xf32, #tpu.memory_space<vmem>>, %arg6: memref<128x128xbf16, #tpu.memory_space<vmem>>, %arg7: memref<128x128xbf16, #tpu.memory_space<vmem>>, %arg8: memref<1x128xf32, #tpu.memory_space<vmem>>, %arg9: memref<8x128xf32, #tpu.memory_space<vmem>>) attributes {dimension_semantics = [#tpu.dimension_semantics<parallel>], iteration_bounds = array<i64: 2>, scalar_prefetch = 0 : i64, scratch_operands = 0 : i64, tpu.core_type = #tpu.core_type<tc>, window_params = [{transform_indices = @transform_0, window_bounds = array<i64: 8, 726>}, {pipeline_mode = #tpu.pipeline_mode<synchronous>, transform_indices = @transform_1, window_bounds = array<i64: 726, 128>}, {pipeline_mode = #tpu.pipeline_mode<synchronous>, transform_indices = @transform_2, window_bounds = array<i64: 1, 128>}, {pipeline_mode = #tpu.pipeline_mode<synchronous>, transform_indices = @transform_3, window_bounds = array<i64: 128, 128>}, {pipeline_mode = #tpu.pipeline_mode<synchronous>, transform_indices = @transform_4, window_bounds = array<i64: 1, 128>}, {pipeline_mode = #tpu.pipeline_mode<synchronous>, transform_indices = @transform_5, window_bounds = array<i64: 128, 128>}, {pipeline_mode = #tpu.pipeline_mode<synchronous>, transform_indices = @transform_6, window_bounds = array<i64: 128, 128>}, {pipeline_mode = #tpu.pipeline_mode<synchronous>, transform_indices = @transform_7, window_bounds = array<i64: 1, 128>}, {transform_indices = @transform_8, window_bounds = array<i64: 8, 128>}]} {
    %c0 = arith.constant 0 : index
    %c0_0 = arith.constant 0 : index
    %0 = vector.load %arg1[%c0, %c0_0] : memref<8x726xf32, #tpu.memory_space<vmem>>, vector<8x726xf32>
    %1 = arith.truncf %0 : vector<8x726xf32> to vector<8x726xbf16>
    %c0_1 = arith.constant 0 : index
    %c0_2 = arith.constant 0 : index
    %2 = vector.load %arg3[%c0_1, %c0_2] : memref<1x128xf32, #tpu.memory_space<vmem>>, vector<1x128xf32>
    %c0_3 = arith.constant 0 : index
    %c0_4 = arith.constant 0 : index
    %3 = vector.load %arg5[%c0_3, %c0_4] : memref<1x128xf32, #tpu.memory_space<vmem>>, vector<1x128xf32>
    %c0_5 = arith.constant 0 : index
    %c0_6 = arith.constant 0 : index
    %4 = vector.load %arg8[%c0_5, %c0_6] : memref<1x128xf32, #tpu.memory_space<vmem>>, vector<1x128xf32>
    %c0_7 = arith.constant 0 : index
    %c0_8 = arith.constant 0 : index
    %5 = vector.load %arg2[%c0_7, %c0_8] : memref<726x128xbf16, #tpu.memory_space<vmem>>, vector<726x128xbf16>
    %cst = arith.constant dense<0.000000e+00> : vector<8x128xf32>
    %6 = tpu.matmul %1, %5, %cst {dimension_numbers = #tpu.dot_dimension_numbers<[1], [0], [0], [1], [0, 0, 1, 1], [], []>} : vector<8x726xbf16>, vector<726x128xbf16>, vector<8x128xf32> -> vector<8x128xf32>
    %7 = vector.broadcast %2 : vector<1x128xf32> to vector<8x128xf32>
    %8 = arith.addf %6, %7 : vector<8x128xf32>
    %cst_9 = arith.constant 0.000000e+00 : f32
    %9 = vector.broadcast %cst_9 : f32 to vector<8x128xf32>
    %10 = arith.maximumf %8, %9 : vector<8x128xf32>
    %11 = arith.truncf %10 : vector<8x128xf32> to vector<8x128xbf16>
    %c0_10 = arith.constant 0 : index
    %c0_11 = arith.constant 0 : index
    %12 = vector.load %arg4[%c0_10, %c0_11] : memref<128x128xbf16, #tpu.memory_space<vmem>>, vector<128x128xbf16>
    %cst_12 = arith.constant dense<0.000000e+00> : vector<8x128xf32>
    %13 = tpu.matmul %11, %12, %cst_12 {dimension_numbers = #tpu.dot_dimension_numbers<[1], [0], [0], [1], [0, 0, 1, 1], [], []>} : vector<8x128xbf16>, vector<128x128xbf16>, vector<8x128xf32> -> vector<8x128xf32>
    %14 = vector.broadcast %3 : vector<1x128xf32> to vector<8x128xf32>
    %15 = arith.addf %13, %14 : vector<8x128xf32>
    %cst_13 = arith.constant 0.000000e+00 : f32
    %16 = vector.broadcast %cst_13 : f32 to vector<8x128xf32>
    %17 = arith.maximumf %15, %16 : vector<8x128xf32>
    %18 = arith.truncf %17 : vector<8x128xf32> to vector<8x128xbf16>
    %c0_14 = arith.constant 0 : index
    %c0_15 = arith.constant 0 : index
    %19 = vector.load %arg7[%c0_14, %c0_15] : memref<128x128xbf16, #tpu.memory_space<vmem>>, vector<128x128xbf16>
    %cst_16 = arith.constant dense<0.000000e+00> : vector<8x128xf32>
    %20 = tpu.matmul %18, %19, %cst_16 {dimension_numbers = #tpu.dot_dimension_numbers<[1], [0], [0], [1], [0, 0, 1, 1], [], []>} : vector<8x128xbf16>, vector<128x128xbf16>, vector<8x128xf32> -> vector<8x128xf32>
    %21 = vector.extract_strided_slice %1 {offsets = [0, 0], sizes = [8, 128], strides = [1, 1]} : vector<8x726xbf16> to vector<8x128xbf16>
    %c0_17 = arith.constant 0 : index
    %c0_18 = arith.constant 0 : index
    %22 = vector.load %arg6[%c0_17, %c0_18] : memref<128x128xbf16, #tpu.memory_space<vmem>>, vector<128x128xbf16>
    %cst_19 = arith.constant dense<0.000000e+00> : vector<8x128xf32>
    %23 = tpu.matmul %21, %22, %cst_19 {dimension_numbers = #tpu.dot_dimension_numbers<[1], [0], [0], [1], [0, 0, 1, 1], [], []>} : vector<8x128xbf16>, vector<128x128xbf16>, vector<8x128xf32> -> vector<8x128xf32>
    %24 = arith.addf %20, %23 : vector<8x128xf32>
    %25 = vector.broadcast %4 : vector<1x128xf32> to vector<8x128xf32>
    %26 = arith.addf %24, %25 : vector<8x128xf32>
    %cst_20 = arith.constant 0.000000e+00 : f32
    %27 = vector.broadcast %cst_20 : f32 to vector<8x128xf32>
    %28 = arith.maximumf %26, %27 : vector<8x128xf32>
    %c0_21 = arith.constant 0 : index
    %c0_22 = arith.constant 0 : index
    %29 = vector.load %arg9[%c0_21, %c0_22] : memref<8x128xf32, #tpu.memory_space<vmem>>, vector<8x128xf32>
    tpu.vector_store %arg9[%c0_21, %c0_22], %28 {strides = array<i32>} : memref<8x128xf32, #tpu.memory_space<vmem>>, vector<8x128xf32>,
    return
  }
  func.func @transform_0(%arg0: i32) -> (i32, i32) {
    %c0_i32 = arith.constant 0 : i32
    %c0_i32_0 = arith.constant 0 : i32
    return %arg0, %c0_i32 : i32, i32
  }
  func.func @transform_1(%arg0: i32) -> (i32, i32) {
    %c0_i32 = arith.constant 0 : i32
    %c0_i32_0 = arith.constant 0 : i32
    %c0_i32_1 = arith.constant 0 : i32
    return %c0_i32, %c0_i32_0 : i32, i32
  }
  func.func @transform_2(%arg0: i32) -> (i32, i32) {
    %c0_i32 = arith.constant 0 : i32
    %c0_i32_0 = arith.constant 0 : i32
    %c0_i32_1 = arith.constant 0 : i32
    return %c0_i32, %c0_i32_0 : i32, i32
  }
  func.func @transform_3(%arg0: i32) -> (i32, i32) {
    %c0_i32 = arith.constant 0 : i32
    %c0_i32_0 = arith.constant 0 : i32
    %c0_i32_1 = arith.constant 0 : i32
    return %c0_i32, %c0_i32_0 : i32, i32
  }
  func.func @transform_4(%arg0: i32) -> (i32, i32) {
    %c0_i32 = arith.constant 0 : i32
    %c0_i32_0 = arith.constant 0 : i32
    %c0_i32_1 = arith.constant 0 : i32
    return %c0_i32, %c0_i32_0 : i32, i32
  }
  func.func @transform_5(%arg0: i32) -> (i32, i32) {
    %c0_i32 = arith.constant 0 : i32
    %c0_i32_0 = arith.constant 0 : i32
    %c0_i32_1 = arith.constant 0 : i32
    return %c0_i32, %c0_i32_0 : i32, i32
  }
  func.func @transform_6(%arg0: i32) -> (i32, i32) {
    %c0_i32 = arith.constant 0 : i32
    %c0_i32_0 = arith.constant 0 : i32
    %c0_i32_1 = arith.constant 0 : i32
    return %c0_i32, %c0_i32_0 : i32, i32
  }
  func.func @transform_7(%arg0: i32) -> (i32, i32) {
    %c0_i32 = arith.constant 0 : i32
    %c0_i32_0 = arith.constant 0 : i32
    %c0_i32_1 = arith.constant 0 : i32
    return %c0_i32, %c0_i32_0 : i32, i32
  }
  func.func @transform_8(%arg0: i32) -> (i32, i32) {
    %c0_i32 = arith.constant 0 : i32
    %c0_i32_0 = arith.constant 0 : i32
    return %arg0, %c0_i32 : i32, i32
  }
}

</mosaic_0001>

<bundles_post_ra>
// kernel: robot_base_forward.1
= control target key start
LH: loop header
LB: loop body
LE: loop exit
PB: predicated region body
PF: predicated region fallthrough
CT: control target
= control target key end

     0   :  { %s2347_s0 = inlined_call_operand.hbm [shape: f32[13,726], index: 0, kind: input, shape index: {}]   ;;  %s2348_s1 = inlined_call_operand.hbm [shape: bf16[726,128], index: 1, kind: input, shape index: {}]   ;;  %s2349_s2 = inlined_call_operand.vmem [shape: f32[1,128], index: 2, kind: input, shape index: {}]   ;;  %s2350_s3 = inlined_call_operand.hbm [shape: bf16[128,128], index: 3, kind: input, shape index: {}]   ;;  %s2351_s4 = inlined_call_operand.vmem [shape: f32[1,128], index: 4, kind: input, shape index: {}]   ;;  %s2352_s5 = inlined_call_operand.hbm [shape: bf16[128,128], index: 5, kind: input, shape index: {}]   ;;  %s2353_s6 = inlined_call_operand.hbm [shape: bf16[128,128], index: 6, kind: input, shape index: {}]   ;;  %s2354_s7 = inlined_call_operand.vmem [shape: f32[1,128], index: 7, kind: input, shape index: {}]   ;;  %s2355_s8 = inlined_call_operand.hbm [shape: f32[13,128], index: 8, kind: output, shape index: {}]  }
   0x1   :  { %2359 = sst [smem:[#allocation16_spill]] %s2348_s1 }
   0x2   :  { %2360 = sst [smem:[#allocation17_spill]] %s2350_s3 }
   0x3   :  { %13 = vsyncpa [#allocation3], 0 }
   0x4   :  { %15 = vsyncpa [#allocation3 + $0x1], 0 }
   0x5   :  { %16 = vsyncpa [#allocation6], 0 }
   0x6   :  { %17 = vsyncpa [#allocation9], 0 }
   0x7   :  { %18 = vsyncpa [#allocation4], 0 }
   0x8   :  { %20 = vsyncpa [#allocation4 + $0x1], 0  ;;  %s2009_s27 = smov 0   ;;  %s2011_s28 = smov 0  }
   0x9   :  { %s2013_s29 = smov 0   ;;  %s2015_s30 = smov 0  }
   0xa LB: > { %s1953_s9 = smov [#allocation5]   ;;  %s2030_s11 = sadd.s32 4294967295, %s1951_s30   ;;  %s1951_s30 = sphi %s2015_s30, %s2382_s30   ;;  %s1947_s29 = sphi %s2013_s29, %s2381_s29   ;;  %s1943_s28 = sphi %s2011_s28, %s2380_s28   ;;  %s1939_s27 = sphi %s2009_s27, %s2379_s27  }
   0xb   : > { %s242_s10 = sshll.u32 %s1953_s9, 4  ;;  %p1348_p0 = scmp.ge.s32.totalorder %s1951_s30, 1  ;;  %s2035_s10 = int_to_ptr.vmem [resolvable:$true] %s242_s10 }
   0xc   : > { %p2356_p1 = scmp.eq.s32.totalorder %s2030_s11, 0  ;;  %p230_p2 = scmp.lt.s32.totalorder %s1951_s30, 3 }
   0xd   : > { %s1954_s13 = smov [#allocation8]   ;;  %s1955_s16 = smov [#allocation7]  }
   0xe   : > { %p2037_p3 = pnand %p1348_p0, %p230_p2  ;;  %s274_s14 = sshll.u32 %s1954_s13, 4  ;;  %s2050_s14 = int_to_ptr.vmem [resolvable:$true] %s274_s14 }
   0xf   : > { %s258_s17 = sshll.u32 %s1955_s16, 4  ;;  %s2363_s1 = sld [smem:[#allocation16_spill]]  ;;  %s2052_s17 = int_to_ptr.vmem [resolvable:$true] %s258_s17 }
  0x10   : > { %s2361_s12 = scalar_select %p2037_p3, 1, 0 }
  0x11   : > { %p1593_p5 = pneg %p2037_p3 }
  0x13   : > { %p2046_p6 = pnand %p1593_p5, %p2356_p1 }
  0x15   : > { %s1735_s20 = scalar_lea.hbm %s2363_s1, 5824  ;;  %p2062_p8 = pneg %p2046_p6 }
  0x16   : > { %p1736_p7 = scmp.ne.s32.totalorder %s2363_s1, %s1735_s20  ;;  %p1742_p11 = scmp.lt.u32.totalorder %s1735_s20, %s2363_s1 }
  0x18   : > { %p1738_p9 = pnand %p2062_p8, %p1736_p7 }
  0x1a   : > { %p1739_p10 = pneg %p1738_p9 }
  0x1c   : > { %p1744_p12 = pnand %p1742_p11, %p1739_p10 }
  0x1e   : > { %1747 = shalt.err (!%p1744_p12)
}
  0x1f   : > { %s1748_s26 = scalar_lea.vmem %s2035_s10, 5824  ;;  %p1756_p5 = scmp.lt.s32.totalorder %s2035_s10, %s2035_s10 }
  0x20   : > { %p1749_p13 = scmp.ne.s32.totalorder %s2035_s10, %s1748_s26  ;;  %p1757_p4 = scmp.lt.s32.totalorder %s1748_s26, %s1748_s26 }
  0x22   : > { %p1751_p0 = pnand %p1749_p13, %p2062_p8  ;;  %p1758_p7 = por %p1757_p4, %p1756_p5 }
  0x24   : > { %p1752_p2 = pneg %p1751_p0 }
  0x26   : > { %p1759_p9 = pnand %p1758_p7, %p1752_p2 }
  0x28   : > { %1762 = shalt.err (!%p1759_p9)
}
  0x29   : > { %s1956_s9 = smov 64   ;;  %s1957_s13 = smov 4  }
  0x2a   : > { %1596 = dma.hbm_to_vmem [thread:$0]  (!%p2046_p6), %s2363_s1, 5824, %s2035_s10, [#allocation6], %s1956_s9, %s1956_s9, %s1957_s13  }
  0x2b   : > { %s1763_s21 = scalar_lea.hbm %s2352_s5, 1024 }
  0x2c   : > { %p1764_p4 = scmp.ne.s32.totalorder %s2352_s5, %s1763_s21  ;;  %p1770_p12 = scmp.lt.u32.totalorder %s1763_s21, %s2352_s5 }
  0x2e   : > { %p1766_p10 = pnand %p1764_p4, %p2062_p8 }
  0x30   : > { %p1767_p11 = pneg %p1766_p10 }
  0x32   : > { %p1772_p13 = pnand %p1770_p12, %p1767_p11 }
  0x34   : > { %1775 = shalt.err (!%p1772_p13)
}
  0x35   : > { %s1776_s10 = scalar_lea.vmem %s2050_s14, 1024  ;;  %p1784_p7 = scmp.lt.s32.totalorder %s2050_s14, %s2050_s14 }
  0x36   : > { %p1777_p0 = scmp.ne.s32.totalorder %s2050_s14, %s1776_s10  ;;  %p1785_p9 = scmp.lt.s32.totalorder %s1776_s10, %s1776_s10 }
  0x38   : > { %p1779_p2 = pnand %p1777_p0, %p2062_p8  ;;  %p1786_p4 = por %p1785_p9, %p1784_p7 }
  0x3a   : > { %p1780_p5 = pneg %p1779_p2 }
  0x3c   : > { %p1787_p10 = pnand %p1786_p4, %p1780_p5 }
  0x3e   : > { %1790 = shalt.err (!%p1787_p10)
}
  0x3f   : > { %1602 = dma.hbm_to_vmem [thread:$0]  (!%p2046_p6), %s2352_s5, 1024, %s2050_s14, [#allocation9], %s1956_s9, %s1956_s9, %s1957_s13  }
  0x40   : > { %s2365_s3 = sld [smem:[#allocation17_spill]] }
  0x46   : > { %s1791_s21 = scalar_lea.hbm %s2365_s3, 1024 }
  0x47   : > { %p1792_p11 = scmp.ne.s32.totalorder %s2365_s3, %s1791_s21  ;;  %p1798_p0 = scmp.lt.u32.totalorder %s1791_s21, %s2365_s3 }
  0x49   : > { %p1794_p12 = pnand %p1792_p11, %p2062_p8 }
  0x4b   : > { %p1795_p13 = pneg %p1794_p12 }
  0x4d   : > { %p1800_p2 = pnand %p1798_p0, %p1795_p13 }
  0x4f   : > { %1803 = shalt.err (!%p1800_p2)
}
  0x50   : > { %s1804_s14 = scalar_lea.vmem %s2052_s17, 1024  ;;  %p1812_p4 = scmp.lt.s32.totalorder %s2052_s17, %s2052_s17 }
  0x51   : > { %p1805_p5 = scmp.ne.s32.totalorder %s2052_s17, %s1804_s14  ;;  %p1813_p10 = scmp.lt.s32.totalorder %s1804_s14, %s1804_s14 }
  0x53   : > { %p1807_p7 = pnand %p1805_p5, %p2062_p8  ;;  %p1814_p11 = por %p1813_p10, %p1812_p4 }
  0x55   : > { %p1808_p9 = pneg %p1807_p7 }
  0x57   : > { %p1815_p12 = pnand %p1814_p11, %p1808_p9 }
  0x59   : > { %1818 = shalt.err (!%p1815_p12)
}
  0x5a   : > { %1599 = dma.hbm_to_vmem [thread:$0]  (!%p2046_p6), %s2365_s3, 1024, %s2052_s17, [#allocation6], %s1956_s9, %s1956_s9, %s1957_s13  }
  0x5b   : > { %s1958_s18 = smov [#allocation10]   ;;  %s1819_s22 = scalar_lea.hbm %s2353_s6, 1024 }
  0x5c   : > { %s287_s19 = sshll.u32 %s1958_s18, 4  ;;  %p1820_p13 = scmp.ne.s32.totalorder %s2353_s6, %s1819_s22  ;;  %s288_s19 = int_to_ptr.vmem [resolvable:$true] %s287_s19 }
  0x5d   : > { %p1826_p5 = scmp.lt.u32.totalorder %s1819_s22, %s2353_s6 }
  0x5e   : > { %p1822_p0 = pnand %p1820_p13, %p2062_p8 }
  0x60   : > { %p1823_p2 = pneg %p1822_p0 }
  0x62   : > { %p1828_p7 = pnand %p1826_p5, %p1823_p2 }
  0x64   : > { %1831 = shalt.err (!%p1828_p7)
}
  0x65   : > { %s1832_s17 = scalar_lea.vmem %s288_s19, 1024  ;;  %p1840_p11 = scmp.lt.s32.totalorder %s288_s19, %s288_s19 }
  0x66   : > { %p1833_p9 = scmp.ne.s32.totalorder %s288_s19, %s1832_s17  ;;  %p1841_p12 = scmp.lt.s32.totalorder %s1832_s17, %s1832_s17 }
  0x68   : > { %p1835_p4 = pnand %p1833_p9, %p2062_p8  ;;  %p1842_p1 = por %p1841_p12, %p1840_p11 }
  0x6a   : > { %p1836_p10 = pneg %p1835_p4 }
  0x6c   : > { %p1843_p3 = pnand %p1842_p1, %p1836_p10 }
  0x6e   : > { %1846 = shalt.err (!%p1843_p3)
}
  0x6f   : > { %1605 = dma.hbm_to_vmem [thread:$0]  (!%p2046_p6), %s2353_s6, 1024, %s288_s19, [#allocation9], %s1956_s9, %s1956_s9, %s1957_s13  }
  0x70   : > { %s1347_s15 = sadd.s32 4294967294, %s1951_s30   ;;  %s2161_s23 = sadd.s32 1, %s1951_s30  }
  0x71   : > { %s30_s18 = ssub.s32 %s1951_s30, %s2161_s23  ;;  %s33_s20 = sadd.s32 1, %s1947_s29 }
  0x72   : > { %p31_p1 = scmp.eq.s32.totalorder %s30_s18, 0  ;;  %p40_p3 = scmp.ne.s32.totalorder %s1947_s29, %s1943_s28 }
  0x73   : > { %p41_p8 = scmp.eq.s32.totalorder %s1951_s30, 0  ;;  %p46_p13 = scmp.ne.s32.totalorder %s1943_s28, %s1939_s27 }
  0x74   : > { %s2172_s21 = scalar_select %p31_p1, %s1947_s29, %s33_s20  }
  0x75   : > { %p42_p0 = por %p41_p8, %p40_p3  ;;  %p2366_p2 = scmp.eq.s32.totalorder %s2030_s11, 0 }
  0x76   : > { %p217_p6 = scmp.eq.s32.totalorder %s2030_s11, 1  ;;  %p223_p7 = scmp.eq.s32.totalorder %s1347_s15, 1 }
  0x77   : > { %p2176_p5 = por %p2366_p2, %p46_p13  ;;  %p1618_p9 = scmp.lt.s32.totalorder %s1951_s30, 2 }
  0x78   : > { %s304_s9 = sand.u32 1, %s1947_s29   ;;  %p2183_p4 = por %p217_p6, %p40_p3 }
  0x79   : > { %p2187_p10 = por %p223_p7, %p46_p13  ;;  %s1570_s24 = smul.u32 48, %s304_s9 }
  0x7a   : > { %s2368_s13 = scalar_select %p2183_p4, 1, 0 }
  0x7b   : > { %s2369_s19 = scalar_select %p2187_p10, 1, 0 }
  0x7c   : > { %s1571_s25 = smul.u32 768, %s1951_s30  ;;  %p2192_p11 = pnand %p1618_p9, %p42_p0 }
  0x7d   : > { %s308_s16 = scalar_lea.vmem [#allocation2], %s1570_s24  ;;  %s305_s18 = scalar_lea.sflag [#allocation3], %s304_s9 }
  0x7e   : > { %s2199_s10 = scalar_lea.hbm %s2347_s0, %s1571_s25  ;;  %s316_s15 = sshll.u32 %s308_s16, 4  ;;  %s2201_s15 = int_to_ptr.vmem [resolvable:$true] %s316_s15 }
  0x7f   : > { %s1847_s20 = scalar_lea.hbm %s2199_s10, 768  ;;  %p1849_p1 = pneg %p2192_p11 }
  0x80   : > { %p1848_p12 = scmp.ne.s32.totalorder %s2199_s10, %s1847_s20  ;;  %s1852_s17 = scalar_lea.hbm %s2347_s0, 1536 }
  0x81   : > { %p1853_p13 = scmp.lt.u32.totalorder %s2199_s10, %s2347_s0  ;;  %p1854_p0 = scmp.lt.u32.totalorder %s1852_s17, %s1847_s20 }
  0x82   : > { %p1850_p3 = pnand %p1849_p1, %p1848_p12  ;;  %p1856_p6 = scmp.lt.u32.totalorder %s1847_s20, %s2199_s10 }
  0x83   : > { %p1855_p2 = por %p1854_p0, %p1853_p13 }
  0x84   : > { %p1851_p8 = pneg %p1850_p3 }
  0x85   : > { %p1857_p7 = por %p1856_p6, %p1855_p2 }
  0x87   : > { %p1858_p9 = pnand %p1857_p7, %p1851_p8 }
  0x89   : > { %1861 = shalt.err (!%p1858_p9)
}
  0x8a   : > { %s1862_s9 = scalar_lea.vmem %s2201_s15, 768  ;;  %s1959_s24 = smov [#allocation2]  }
  0x8b   : > { %p1863_p12 = scmp.ne.s32.totalorder %s2201_s15, %s1862_s9  ;;  %s1867_s16 = sshll.u32 %s1959_s24, 4  ;;  %s1868_s16 = int_to_ptr.vmem [resolvable:$false] %s1867_s16 }
  0x8c   : > { %s1869_s1 = scalar_lea.vmem %s1868_s16, 1536  ;;  %p1870_p4 = scmp.lt.s32.totalorder %s2201_s15, %s1868_s16 }
  0x8d   : > { %p1865_p3 = pnand %p1863_p12, %p1849_p1  ;;  %p1871_p13 = scmp.lt.s32.totalorder %s1869_s1, %s1862_s9 }
  0x8f   : > { %p1866_p10 = pneg %p1865_p3  ;;  %p1872_p0 = por %p1871_p13, %p1870_p4 }
  0x91   : > { %p1873_p2 = pnand %p1872_p0, %p1866_p10 }
  0x93   : > { %1876 = shalt.err (!%p1873_p2)
}
  0x94   : > { %1609 = dma.hbm_to_vmem [thread:$0]  (!%p2192_p11), %s2199_s10, 768, %s2201_s15, %s305_s18  }
  0x95   : > { %p2371_p8 = scmp.ne.s32.totalorder %s2361_s12, 0 }
  0x96   : > { %s2231_s3 = sand.u32 (!%p2371_p8), 1, %s1943_s28  }
  0x97   : > { %325 = sbr.rel (%p2371_p8) target bundleno = 922 (0x39a), region = 52  ;;  %s328_s14 = scalar_lea.sflag (!%p2371_p8), [#allocation3], %s2231_s3 }
  0x98   : > { %s1572_s20 = smul.u32 (!%p2371_p8), 48, %s2231_s3 }
  0x9a   : > { %s2235_s25 = scalar_lea.vmem (!%p2371_p8), [#allocation2], %s1572_s20 }
  0x9e   : > { %1922 = dma.done.wait (%p2176_p5), %s328_s14, 768  }
  0x9f   : > { %1924 = vsyncadd (%p2176_p5), %s328_s14, 4294966528  ;;  %p2372_p4 = scmp.eq.s32.totalorder %s2030_s11, 0 }
  0xa1   : > { %1926 = dma.done.wait (%p2372_p4), [#allocation6], 6848   ;;  %p2373_p10 = pmov %p2372_p4 }
  0xa2   : > { %p2374_p11 = pmov %p2372_p4 }
  0xa3   : > { %1928 = vsyncadd (%p2373_p10), [#allocation6], 4294960448 }
  0xa4   : > { %1930 = dma.done.wait (%p2374_p11), [#allocation9], 2048   ;;  %p2375_p1 = pmov %p2372_p4 }
  0xa5   : > { %v1665_v0 = vld [vmem:[#allocation5 + $0x40] sm:$0xff]   ;;  %v1669_v4 = vld [vmem:[#allocation5 + $0x48] sm:$0xff]   ;;  %v1673_v8 = vld [vmem:[#allocation5 + $0x50] sm:$0xff]   ;;  %v1960_v35 = vmov 0   ;;  %vm766_vm0 = vcmask 703488   ;;  %vm770_vm1 = vcmask 1042432  }
  0xa6   : > { %1932 = vsyncadd (%p2375_p1), [#allocation9], 4294965248  ;;  %v1666_v1 = vld [vmem:[#allocation5] sm:$0xff]   ;;  %1439 = vmatprep.subr.bf16.mxu0 %v1665_v0  ;;  %v1670_v5 = vld [vmem:[#allocation5 + $0x8] sm:$0xff]   ;;  %v1961_v61 = vmov 0.0   ;;  %vm1962_vm2 = vmmov 0  }
  0xa7   : > { %v1667_v2 = vld [vmem:[#allocation5 + $0xc0] sm:$0xff]   ;;  %1440 = vmatpush3.bf16.msra.mxu0 %v1666_v1  ;;  %v1671_v6 = vld [vmem:[#allocation5 + $0xc8] sm:$0xff]   ;;  %v1674_v9 = vld [vmem:[#allocation5 + $0x10] sm:$0xff]   ;;  %s1360_s15 = sshll.u32 %s2231_s3, 3  ;;  %s1436_s9 = sshll.u32 %s2030_s11, 7 }
  0xa8   : > { %v1668_v3 = vld [vmem:[#allocation5 + $0x80] sm:$0xff]   ;;  %1461 = vmatprep.subr.bf16.mxu1 %v1667_v2  ;;  %1441 = vmatprep.subr.bf16.mxu0 %v1669_v4  ;;  %v1672_v7 = vld [vmem:[#allocation5 + $0x88] sm:$0xff]   ;;  %v1675_v10 = vld [vmem:[#allocation5 + $0xd0] sm:$0xff]   ;;  %s379_s24 = scalar_lea.vmem [#allocation11], %s1360_s15  ;;  %s2303_s14 = scalar_lea.hbm %s2355_s8, %s1436_s9 }
  0xa9   : > { %1462 = vmatpush3.bf16.msra.mxu1 %v1668_v3  ;;  %v1676_v11 = vld [vmem:[#allocation5 + $0x90] sm:$0xff]   ;;  %v1677_v12 = vld [vmem:[#allocation5 + $0x58] sm:$0xff]   ;;  %v1681_v16 = vld [vmem:[#allocation5 + $0x60] sm:$0xff]   ;;  %s1239_s16 = sshll.u32 %s379_s24, 4  ;;  %p2376_p6 = scmp.ne.s32.totalorder %s2368_s13, 0  ;;  %s2305_s16 = int_to_ptr.vmem [resolvable:$true] %s1239_s16 }
  0xaa   : > { %1463 = vmatprep.subr.bf16.mxu1 %v1671_v6  ;;  %v1678_v13 = vld [vmem:[#allocation5 + $0x18] sm:$0xff]   ;;  %v1682_v17 = vld [vmem:[#allocation5 + $0x20] sm:$0xff]   ;;  %v1685_v20 = vld [vmem:[#allocation5 + $0x68] sm:$0xff]   ;;  %s1877_s12 = scalar_lea.vmem %s2305_s16, 128  ;;  %s1963_s11 = smov [#allocation11]  }
  0xab   : > { %1442 = vmatpush3.bf16.msra.mxu0 %v1670_v5  ;;  %v1679_v14 = vld [vmem:[#allocation5 + $0xd8] sm:$0xff]   ;;  %v1683_v18 = vld [vmem:[#allocation5 + $0xe0] sm:$0xff]   ;;  %v1686_v21 = vld [vmem:[#allocation5 + $0x28] sm:$0xff]   ;;  %p1878_p5 = scmp.ne.s32.totalorder %s2305_s16, %s1877_s12  ;;  %s1881_s22 = sshll.u32 %s1963_s11, 4  ;;  %s1882_s22 = int_to_ptr.vmem [resolvable:$false] %s1881_s22 }
  0xac   : > { %1443 = vmatprep.subr.bf16.mxu0 %v1673_v8  ;;  %v1680_v15 = vld [vmem:[#allocation5 + $0x98] sm:$0xff]   ;;  %v1684_v19 = vld [vmem:[#allocation5 + $0xa0] sm:$0xff]   ;;  %v1687_v22 = vld [vmem:[#allocation5 + $0xe8] sm:$0xff]   ;;  %s1883_s26 = scalar_lea.vmem %s1882_s22, 256  ;;  %p1884_p12 = scmp.lt.s32.totalorder %s2305_s16, %s1882_s22 }
  0xad   : > { %1464 = vmatpush3.bf16.msra.mxu1 %v1672_v7  ;;  %v1688_v23 = vld [vmem:[#allocation5 + $0xa8] sm:$0xff]   ;;  %v1689_v24 = vld [vmem:[#allocation5 + $0x70] sm:$0xff]   ;;  %v1693_v28 = vld [vmem:[#allocation5 + $0x78] sm:$0xff]   ;;  %p1879_p7 = pnand %p1878_p5, %p2376_p6  ;;  %p1885_p3 = scmp.lt.s32.totalorder %s1883_s26, %s1877_s12 }
  0xae   : > { %1465 = vmatprep.subr.bf16.mxu1 %v1675_v10  ;;  %v1690_v25 = vld [vmem:[#allocation5 + $0x30] sm:$0xff]   ;;  %v1694_v29 = vld [vmem:[#allocation5 + $0x38] sm:$0xff]   ;;  %v1697_v39 = vld [vmem:[#allocation5 + $0x100] sm:$0xff]  }
  0xaf   : > { %1444 = vmatpush3.bf16.msra.mxu0 %v1674_v9  ;;  %v1691_v26 = vld [vmem:[#allocation5 + $0xf0] sm:$0xff]   ;;  %v1695_v30 = vld [vmem:[#allocation5 + $0xf8] sm:$0xff]   ;;  %v1698_v42 = vld [vmem:[#allocation5 + $0x108] sm:$0xff]   ;;  %p1880_p9 = pneg %p1879_p7  ;;  %p1886_p13 = por %p1885_p3, %p1884_p12 }
  0xb0   : > { %1445 = vmatprep.subr.bf16.mxu0 %v1677_v12  ;;  %v1692_v27 = vld [vmem:[#allocation5 + $0xb0] sm:$0xff]   ;;  %v382_v31 = vld [vmem:[%s2235_s25 + $0x8] sm:$0xff]  ;;  %v384_v36 = vld [vmem:[%s2235_s25 + $0x18] sm:$0xff] }
  0xb1   : > { %1466 = vmatpush3.bf16.msra.mxu1 %v1676_v11  ;;  %v388_v32 = vpack.c.bf16 %v382_v31, %v382_v31  ;;  %v1696_v33 = vld [vmem:[#allocation5 + $0xb8] sm:$0xff]   ;;  %v381_v34 = vld [vmem:[%s2235_s25] sm:$0xff]  ;;  %v390_v38 = vpack.c.bf16 %v384_v36, %v384_v36  ;;  %v383_v40 = vld [vmem:[%s2235_s25 + $0x10] sm:$0xff]  ;;  %p1887_p0 = pnand %p1886_p13, %p1880_p9 }
  0xb2   : > { %1467 = vmatprep.subr.bf16.mxu1 %v1679_v14  ;;  %v2252_v37 = vpack.c.bf16 %v381_v34, %v381_v34  ;;  %v389_v41 = vpack.c.bf16 %v383_v40, %v383_v40  ;;  %v1699_v43 = vld [vmem:[#allocation5 + $0x110] sm:$0xff]   ;;  %v1700_v44 = vld [vmem:[#allocation5 + $0x118] sm:$0xff]   ;;  %v1701_v46 = vld [vmem:[#allocation5 + $0x120] sm:$0xff]  }
  0xb3   : > { %1446 = vmatpush3.bf16.msra.mxu0 %v1678_v13  ;;  %806 = vmatprep.mubr.bf16.mxu0 %v388_v32  ;;  %v386_v45 = vld [vmem:[%s2235_s25 + $0x28] sm:$0xff]  ;;  %v1703_v49 = vld [vmem:[#allocation5 + $0x130] sm:$0xff]   ;;  %v1705_v51 = vld [vmem:[#allocation5 + $0x140] sm:$0xff]  }
  0xb4   : > { %1447 = vmatprep.subr.bf16.mxu0 %v1681_v16  ;;  %846 = vmatprep.mubr.bf16.mxu1 %v390_v38  ;;  %v392_v47 = vpack.c.bf16 %v386_v45, %v386_v45  ;;  %v1702_v48 = vld [vmem:[#allocation5 + $0x128] sm:$0xff]   ;;  %v1704_v50 = vld [vmem:[#allocation5 + $0x138] sm:$0xff]   ;;  %v1707_v53 = vld [vmem:[#allocation5 + $0x150] sm:$0xff]  }
  0xb5   : > { %1468 = vmatpush3.bf16.msra.mxu1 %v1680_v15  ;;  %v1706_v52 = vld [vmem:[#allocation5 + $0x148] sm:$0xff]   ;;  %v1708_v54 = vld [vmem:[#allocation5 + $0x158] sm:$0xff]   ;;  %v1709_v55 = vld [vmem:[#allocation5 + $0x160] sm:$0xff]  }
  0xb6   : > { %1469 = vmatprep.subr.bf16.mxu1 %v1683_v18  ;;  %v1710_v56 = vld [vmem:[#allocation5 + $0x168] ss:$0 sps:$4 sm:$0x77]   ;;  %v385_v57 = vld [vmem:[%s2235_s25 + $0x20] sm:$0xff]  ;;  %s1226_s25 = scalar_lea.sflag [#allocation4], %s2231_s3 }
  0xb7   : > { %1448 = vmatpush3.bf16.msra.mxu0 %v1682_v17  ;;  %v772_v58 = vsel %vm770_vm1, %v1710_v56, 0  ;;  %v391_v59 = vpack.c.bf16 %v385_v57, %v385_v57  ;;  %v1711_v60 = vld [vmem:[#allocation7] sm:$0xff]   ;;  %v1712_v62 = vld [vmem:[#allocation7 + $0x8] sm:$0xff]   ;;  %v1713_v63 = vld [vmem:[#allocation7 + $0x10] sm:$0xff]  }
  0xb8   : > { %1449 = vmatprep.subr.bf16.mxu0 %v1685_v20  ;;  %v1714_v0 = vld [vmem:[#allocation7 + $0x18] sm:$0xff]   ;;  %v1715_v1 = vld [vmem:[#allocation7 + $0x20] sm:$0xff]   ;;  %v1716_v2 = vld [vmem:[#allocation7 + $0x28] sm:$0xff]  }
  0xb9   : > { %1470 = vmatpush3.bf16.msra.mxu1 %v1684_v19  ;;  %v1717_v3 = vld [vmem:[#allocation7 + $0x30] sm:$0xff]   ;;  %v1718_v4 = vld [vmem:[#allocation7 + $0x38] sm:$0xff]   ;;  %v1720_v5 = vld [vmem:[#allocation10] sm:$0xff]  }
  0xba   : > { %1471 = vmatprep.subr.bf16.mxu1 %v1687_v22  ;;  %v1722_v6 = vld [vmem:[#allocation10 + $0x8] sm:$0xff]   ;;  %v1724_v7 = vld [vmem:[#allocation10 + $0x10] sm:$0xff]   ;;  %v1726_v8 = vld [vmem:[#allocation10 + $0x18] sm:$0xff]  }
  0xbb   : > { %1450 = vmatpush3.bf16.msra.mxu0 %v1686_v21  ;;  %v1728_v9 = vld [vmem:[#allocation10 + $0x20] sm:$0xff]   ;;  %v1730_v10 = vld [vmem:[#allocation10 + $0x28] sm:$0xff]   ;;  %v1361_v12 = vld [vmem:[%s2349_s2] ss:$0 sm:$0xff] }
  0xbc   : > { %1451 = vmatprep.subr.bf16.mxu0 %v1689_v24  ;;  %v1721_v32 = vld [vmem:[#allocation8 + $0x8] sm:$0xff]   ;;  %v1725_v34 = vld [vmem:[#allocation8 + $0x18] sm:$0xff]   ;;  %v1731_v38 = vld [vmem:[#allocation8 + $0x30] sm:$0xff]  }
  0xbd   : > { %1472 = vmatpush3.bf16.msra.mxu1 %v1688_v23  ;;  %v1729_v36 = vld [vmem:[#allocation8 + $0x28] sm:$0xff]   ;;  %v1733_v40 = vld [vmem:[#allocation8 + $0x38] sm:$0xff]  }
  0xbe   : > { %1473 = vmatprep.subr.bf16.mxu1 %v1691_v26 }
  0xbf   : > { %1452 = vmatpush3.bf16.msra.mxu0 %v1690_v25 }
  0xc0   : > { %1453 = vmatprep.subr.bf16.mxu0 %v1693_v28 }
  0xc1   : > { %1474 = vmatpush3.bf16.msra.mxu1 %v1692_v27 }
  0xc2   : > { %1475 = vmatprep.subr.bf16.mxu1 %v1695_v30  ;;  %v1719_v30 = vld [vmem:[#allocation8] sm:$0xff]  }
  0xc3   : > { %1454 = vmatpush3.bf16.msra.mxu0 %v1694_v29 }
  0xc4   : > { %854 = vmatprep.subr.bf16.mxu0 %v1960_v35 }
  0xc5   : > { %1476 = vmatpush3.bf16.msra.mxu1 %v1696_v33  ;;  %v1723_v33 = vld [vmem:[#allocation8 + $0x10] sm:$0xff]  }
  0xc6   : > { %807 = vmatmul.mubr.bf16.vlgmr.msra.gmra.mrb[0].mxu0 %v2252_v37  ;;  %1510 = vmatprep.subr.bf16.mxu1 %v1961_v61 }
  0xc7   : > { %855 = vmatpush1.bf16.msra.mxu0 %v1697_v39  ;;  %1408 = vmatprep.mubr.msk.bf16.mxu0 %vm766_vm0, %v392_v47  ;;  %v1732_v39 = vld [vmem:[#allocation10 + $0x30] sm:$0xff]  }
  0xc8   : > { %847 = vmatmul.mubr.bf16.vlgmr.msra.gmra.mrb[0].mxu1 %v389_v41  ;;  %856 = vmatprep.subr.bf16.mxu0 %v1960_v35  ;;  %v1734_v41 = vld [vmem:[#allocation10 + $0x38] sm:$0xff]  }
  0xc9   : > { %1511 = vmatpush3.bf16.msra.mxu1 %v1711_v60  ;;  %1526 = vmatprep.mubr.msk.bf16.mxu1 %vm1962_vm2, %v1961_v61 }
  0xca   : > { %1512 = vmatprep.subr.bf16.mxu1 %v1961_v61 }
  0xcb   : > { %857 = vmatpush1.bf16.msra.mxu0 %v1698_v42  ;;  %v1409_v42 = vld [vmem:[%s2351_s4] ss:$0 sm:$0xff] }
  0xcc   : > { %858 = vmatprep.subr.bf16.mxu0 %v1960_v35 }
  0xcd   : > { %1513 = vmatpush3.bf16.msra.mxu1 %v1712_v62 }
  0xce   : > { %1514 = vmatprep.subr.bf16.mxu1 %v1961_v61 }
  0xcf   : > { %859 = vmatpush1.bf16.msra.mxu0 %v1699_v43 }
  0xd0   : > { %860 = vmatprep.subr.bf16.mxu0 %v1960_v35 }
  0xd1   : > { %1515 = vmatpush3.bf16.msra.mxu1 %v1713_v63 }
  0xd2   : > { %1516 = vmatprep.subr.bf16.mxu1 %v1961_v61 }
  0xd3   : > { %861 = vmatpush1.bf16.msra.mxu0 %v1700_v44 }
  0xd4   : > { %862 = vmatprep.subr.bf16.mxu0 %v1960_v35 }
  0xd5   : > { %1517 = vmatpush3.bf16.msra.mxu1 %v1714_v0 }
  0xd6   : > { %1518 = vmatprep.subr.bf16.mxu1 %v1961_v61 }
  0xd7   : > { %863 = vmatpush1.bf16.msra.mxu0 %v1701_v46 }
  0xd8   : > { %864 = vmatprep.subr.bf16.mxu0 %v1960_v35 }
  0xd9   : > { %1519 = vmatpush3.bf16.msra.mxu1 %v1715_v1 }
  0xda   : > { %1520 = vmatprep.subr.bf16.mxu1 %v1961_v61 }
  0xdb   : > { %865 = vmatpush1.bf16.msra.mxu0 %v1702_v48 }
  0xdc   : > { %866 = vmatprep.subr.bf16.mxu0 %v1960_v35 }
  0xdd   : > { %1521 = vmatpush3.bf16.msra.mxu1 %v1716_v2 }
  0xde   : > { %1522 = vmatprep.subr.bf16.mxu1 %v1961_v61 }
  0xdf   : > { %867 = vmatpush1.bf16.msra.mxu0 %v1703_v49 }
  0xe0   : > { %868 = vmatprep.subr.bf16.mxu0 %v1960_v35 }
  0xe1   : > { %1523 = vmatpush3.bf16.msra.mxu1 %v1717_v3 }
  0xe2   : > { %1524 = vmatprep.subr.bf16.mxu1 %v1961_v61 }
  0xe3   : > { %869 = vmatpush1.bf16.msra.mxu0 %v1704_v50 }
  0xe4   : > { %870 = vmatprep.subr.bf16.mxu0 %v1960_v35 }
  0xe5   : > { %1525 = vmatpush3.bf16.msra.mxu1 %v1718_v4 }
  0xe6   : > { %1530 = vmatprep.subr.bf16.mxu1 %v1961_v61 }
  0xe7   : > { %871 = vmatpush1.bf16.msra.mxu0 %v1705_v51 }
  0xe8   : > { %872 = vmatprep.subr.bf16.mxu0 %v1960_v35 }
  0xeb   : > { %873 = vmatpush1.bf16.msra.mxu0 %v1706_v52 }
  0xec   : > { %874 = vmatprep.subr.bf16.mxu0 %v1960_v35 }
  0xef   : > { %875 = vmatpush1.bf16.msra.mxu0 %v1707_v53 }
  0xf0   : > { %876 = vmatprep.subr.bf16.mxu0 %v1960_v35 }
  0xf3   : > { %877 = vmatpush1.bf16.msra.mxu0 %v1708_v54 }
  0xf4   : > { %878 = vmatprep.subr.bf16.mxu0 %v1960_v35 }
  0xf7   : > { %879 = vmatpush1.bf16.msra.mxu0 %v1709_v55 }
  0xf8   : > { %880 = vmatprep.subr.bf16.mxu0 %v1960_v35  ;;  %v1727_v35 = vld [vmem:[#allocation8 + $0x20] sm:$0xff]  }
  0xfb   : > { %881 = vmatpush1.bf16.msra.mxu0 %v772_v58 }
  0xfc   : > { %1550 = vmatprep.subr.bf16.mxu0 %v1961_v61 }
  0xfe   : > { %887 = vmatmul.mubr.bf16.vlgmr.msra.gmra.mrb[4].mxu0 %v391_v59 }
  0xff   : > { %1566 = vmatprep.mubr.msk.bf16.mxu0 %vm1962_vm2, %v1961_v61  ;;  %1551 = vmatpush3.bf16.msra.mxu0 %v1720_v5 }
 0x100   : > { %1552 = vmatprep.subr.bf16.mxu0 %v1961_v61 }
 0x103   : > { %1553 = vmatpush3.bf16.msra.mxu0 %v1722_v6 }
 0x104   : > { %1554 = vmatprep.subr.bf16.mxu0 %v1961_v61 }
 0x107   : > { %1555 = vmatpush3.bf16.msra.mxu0 %v1724_v7 }
 0x108   : > { %1556 = vmatprep.subr.bf16.mxu0 %v1961_v61 }
 0x10b   : > { %1557 = vmatpush3.bf16.msra.mxu0 %v1726_v8 }
 0x10c   : > { %1558 = vmatprep.subr.bf16.mxu0 %v1961_v61 }
 0x10f   : > { %1559 = vmatpush3.bf16.msra.mxu0 %v1728_v9 }
 0x110   : > { %1560 = vmatprep.subr.bf16.mxu0 %v1961_v61 }
 0x113   : > { %1561 = vmatpush3.bf16.msra.mxu0 %v1730_v10 }
 0x114   : > { %1562 = vmatprep.subr.bf16.mxu0 %v1961_v61 }
 0x117   : > { %1563 = vmatpush3.bf16.msra.mxu0 %v1732_v39 }
 0x118   : > { %1564 = vmatprep.subr.bf16.mxu0 %v1961_v61 }
 0x11b   : > { %1565 = vmatpush3.bf16.msra.mxu0 %v1734_v41 }
 0x199   : > { %v1455_v11 = vpop.f32.mrb[0].mxu0 }
 0x19a   : > { %v1456_v13 = vpop.f32.mrb[1].mxu0 }
 0x19b   : > { %v1457_v14 = vadd.f32 %v1456_v13, %v1455_v11  ;;  %v1458_v15 = vpop.f32.mrb[2].mxu0  ;;  %v1477_v16 = vpop.f32.mrb[0].mxu1 }
 0x19c   : > { %v1459_v17 = vpop.f32.mrb[3].mxu0  ;;  %v1478_v18 = vpop.f32.mrb[1].mxu1 }
 0x19d   : > { %v809_v19 = vadd.f32 %v1457_v14, %v1361_v12  ;;  %v1479_v20 = vadd.f32 %v1478_v18, %v1477_v16  ;;  %v1480_v21 = vpop.f32.mrb[2].mxu1 }
 0x19e   : > { %v1481_v22 = vpop.f32.mrb[3].mxu1 }
 0x19f   : > { %v849_v23 = vadd.f32 %v1479_v20, %v809_v19 }
 0x1d1   : > { %v888_v24 = vpop.f32.mrb[4].mxu0 }
 0x1d2   : > { %v889_v25 = vadd.f32 %v888_v24, %v849_v23  ;;  %v890_v26 = vpop.f32.mrb[5].mxu0 }
 0x1d3   : > { %v891_v27 = vpop.f32.mrb[6].mxu0 }
 0x1d4   : > { %v894_v28 = vmax.f32 %v889_v25, 0.0  ;;  %v892_v29 = vpop.f32.mrb[7].mxu0 }
 0x1d6   : > { %v895_v31 = vpack.c.bf16 %v894_v28, %v894_v28 }
 0x1d8   : > { %1527 = vmatmul.mubr.bf16.vlgmr.msra.gmra.mrb[4].mxu1 %v895_v31 }
 0x1d9   : > { %1531 = vmatpush3.bf16.msra.mxu1 %v1719_v30  ;;  %1546 = vmatprep.mubr.msk.bf16.mxu1 %vm1962_vm2, %v1961_v61 }
 0x1da   : > { %1532 = vmatprep.subr.bf16.mxu1 %v1961_v61 }
 0x1dd   : > { %1533 = vmatpush3.bf16.msra.mxu1 %v1721_v32 }
 0x1de   : > { %1534 = vmatprep.subr.bf16.mxu1 %v1961_v61 }
 0x1e1   : > { %1535 = vmatpush3.bf16.msra.mxu1 %v1723_v33 }
 0x1e2   : > { %1536 = vmatprep.subr.bf16.mxu1 %v1961_v61 }
 0x1e5   : > { %1537 = vmatpush3.bf16.msra.mxu1 %v1725_v34 }
 0x1e6   : > { %1538 = vmatprep.subr.bf16.mxu1 %v1961_v61 }
 0x1e9   : > { %1539 = vmatpush3.bf16.msra.mxu1 %v1727_v35 }
 0x1ea   : > { %1540 = vmatprep.subr.bf16.mxu1 %v1961_v61 }
 0x1ed   : > { %1541 = vmatpush3.bf16.msra.mxu1 %v1729_v36 }
 0x1ee   : > { %1542 = vmatprep.subr.bf16.mxu1 %v1961_v61 }
 0x1f1   : > { %1543 = vmatpush3.bf16.msra.mxu1 %v1731_v38 }
 0x1f2   : > { %1544 = vmatprep.subr.bf16.mxu1 %v1961_v61 }
 0x1f5   : > { %1545 = vmatpush3.bf16.msra.mxu1 %v1733_v40 }
 0x1f8   : > { %1547 = vmatmul.mubr.bf16.vlgmr.msra.gmra.mrb[8].mxu1 %v2252_v37  ;;  %v1434_v37 = vld [vmem:[%s2354_s7] ss:$0 sm:$0xff] }
 0x2ab   : > { %v1000_v43 = vpop.f32.mrb[4].mxu1 }
 0x2ac   : > { %v1001_v44 = vadd.f32 %v1409_v42, %v1000_v43  ;;  %v1528_v45 = vpop.f32.mrb[5].mxu1 }
 0x2ad   : > { %v1003_v46 = vpop.f32.mrb[6].mxu1 }
 0x2ae   : > { %v1006_v47 = vmax.f32 %v1001_v44, 0.0  ;;  %v1529_v48 = vpop.f32.mrb[7].mxu1 }
 0x2b0   : > { %v1007_v49 = vpack.c.bf16 %v1006_v47, %v1006_v47 }
 0x2b2   : > { %1567 = vmatmul.mubr.bf16.vlgmr.msra.gmra.mrb[8].mxu0 %v1007_v49 }
 0x2cb   : > { %v1122_v50 = vpop.f32.mrb[8].mxu1 }
 0x2cc   : > { %v1548_v51 = vpop.f32.mrb[9].mxu1 }
 0x2cd   : > { %v1125_v52 = vpop.f32.mrb[10].mxu1 }
 0x2ce   : > { %v1549_v53 = vpop.f32.mrb[11].mxu1 }
 0x385   : > { %v1210_v54 = vpop.f32.mrb[8].mxu0 }
 0x386   : > { %v1211_v55 = vadd.f32 %v1210_v54, %v1122_v50  ;;  %v1568_v56 = vpop.f32.mrb[9].mxu0 }
 0x387   : > { %v1213_v57 = vpop.f32.mrb[10].mxu0 }
 0x388   : > { %v1222_v58 = vadd.f32 %v1434_v37, %v1211_v55  ;;  %v1569_v59 = vpop.f32.mrb[11].mxu0 }
 0x38a   : > { %v1223_v60 = vmax.f32 %v1222_v58, 0.0 }
 0x38c   : > { %1224 = vst [vmem:[%s379_s24] sm:$0xff] %v1223_v60 }
 0x38d   : > { %1890 = shalt.err (!%p1887_p0)
}
 0x38e   : > { %s1891_s3 = scalar_lea.hbm %s2303_s14, 128  ;;  %s1895_s18 = scalar_lea.hbm %s2355_s8, 256 }
 0x38f   : > { %p1892_p2 = scmp.ne.s32.totalorder %s2303_s14, %s1891_s3  ;;  %p1896_p10 = scmp.lt.u32.totalorder %s2303_s14, %s2355_s8 }
 0x390   : > { %p1897_p11 = scmp.lt.u32.totalorder %s1895_s18, %s1891_s3  ;;  %p1899_p5 = scmp.lt.u32.totalorder %s1891_s3, %s2303_s14 }
 0x391   : > { %p1893_p8 = pnand %p1892_p2, %p2376_p6 }
 0x392   : > { %p1898_p1 = por %p1897_p11, %p1896_p10 }
 0x393   : > { %p1894_p4 = pneg %p1893_p8 }
 0x394   : > { %p1900_p7 = por %p1899_p5, %p1898_p1 }
 0x396   : > { %p1901_p9 = pnand %p1900_p7, %p1894_p4 }
 0x398   : > { %1904 = shalt.err (!%p1901_p9)
}
 0x399   : > { %1591 = dma.vmem_to_hbm [thread:$0]  (%p2376_p6), %s2305_s16, 128, %s2303_s14, %s1226_s25  }
 0x39a PF: > { %s1251_s24 = sand.u32 1, %s1939_s27   ;;  %p2377_p12 = scmp.ne.s32.totalorder %s2369_s19, 0 }
 0x39b   : > { %p2378_p3 = scmp.ge.s32.totalorder %s1951_s30, 2  ;;  %s1252_s1 = scalar_lea.sflag [#allocation4], %s1251_s24 }
 0x39d   : > { %p1611_p13 = pnand %p2378_p3, %p2377_p12 }
 0x39f   : > { %1934 = dma.done.wait (!%p1611_p13), %s1252_s1, 128  }
 0x3a0   : > { %1936 = vsyncadd (!%p1611_p13), %s1252_s1, 4294967168  ;;  %p23_p0 = scmp.ge.s32.totalorder %s2161_s23, 4   ;;  %s2379_s27 = smov %s1943_s28 }
 0x3a1   : > { %s2380_s28 = smov %s1947_s29  ;;  %s2381_s29 = smov %s2172_s21 }
 0x3a2   : > { %s2382_s30 = smov %s2161_s23  ;;  %25 = sbr.rel (!%p23_p0) target bundleno = 10 (0xa), region = 113 }
 0x3a9   :  { %1257 = vsyncpa [#allocation3], 1 }
 0x3aa   :  { %1259 = vsyncpa [#allocation3 + $0x1], 1 }
 0x3ab   :  { %1260 = vsyncpa [#allocation6], 1 }
 0x3ac   :  { %1261 = vsyncpa [#allocation9], 1 }
 0x3ad   :  { %1262 = vsyncpa [#allocation4], 1 }
 0x3ae   :  { %1264 = vsyncpa [#allocation4 + $0x1], 1 }

</bundles_post_ra>
